<compile_context>
chip_gen: v5e
topology: v5e:2x2
jax: 0.10.0
libtpu: 0.0.40
codegen_flags: <defaults>
</compile_context>

<pallas_src>
import numpy as np
import jax
import jax.numpy as jnp
from jax import lax
from jax.experimental import pallas as pl
from jax.experimental.pallas import tpu as pltpu

# small synthetic sizes consistent with the module
M = 3        # number of modalities
B = 16       # batch
D = 32       # per-modality raw input dim (encoder input)
H = 32       # hidden_dim
C = 3        # num_classes

MD = M * D          # 96  packed input lanes
MH = M * H          # 96  packed feature lanes
DPAD = 128          # lane-padded input width (incl. the ones lane)
SPAD = 128          # lane-padded slab width (feats | scores | const-1 | zeros)
CPAD = 128          # lane-dense padded class dimension

ONE_ROW = MD        # lane 96 of padded x holds constant 1.0 (drives all biases)
SCORE0 = MH         # slab lanes 96..96+M-1 hold the attention scores
CONST_LANE = MH + M  # slab lane 99 holds constant 1.0 (drives classifier bias)


def multimodal_kernel(x_ref, w_big_ref, expand_ref, w_cls_ref, out_ref):
    # x_ref:      (B, 128)   modality-packed inputs, lane 96 == 1.0, rest zero-pad
    # w_big_ref:  (128, 128) block-diag encoder weights | score cols | const col,
    #                        with all biases folded into row ONE_ROW
    # expand_ref: (128, 128) maps softmax weights (lanes 96..98) onto per-modality
    #                        H-lane blocks + the const lane
    # w_cls_ref:  (128, 128) modality-stacked classifier weight (cols 0..C-1),
    #                        row CONST_LANE holds the classifier bias
    # out_ref:    (B, 128)   lane-dense output block

    # --- encoders + attention scores in ONE MXU pass ---
    slab = jnp.dot(x_ref[...], w_big_ref[...],
                   preferred_element_type=jnp.float32)            # (B, 128)

    # --- softmax over the M score lanes (mask out feats / pad lanes) ---
    lane = lax.broadcasted_iota(jnp.int32, slab.shape, 1)
    smask = (lane >= SCORE0) & (lane < SCORE0 + M)
    s = jnp.where(smask, slab, -jnp.inf)
    s_max = jnp.max(s, axis=-1, keepdims=True)
    e = jnp.where(smask, jnp.exp(s - s_max), 0.0)
    denom = jnp.sum(e, axis=-1, keepdims=True)
    weights = e * pl.reciprocal(denom, approx=True)                # (B, 128), nz at 96..98

    # --- replicate per-modality weights across their H lanes (+ const lane) ---
    w_rep = jnp.dot(weights, expand_ref[...],
                    preferred_element_type=jnp.float32)            # (B, 128)

    # --- fused weighted-sum over modalities + classifier (+ bias) in one matmul ---
    out = jnp.dot(slab * w_rep, w_cls_ref[...],
                  preferred_element_type=jnp.float32)              # (B, 128)
    out_ref[...] = out.astype(out_ref.dtype)


def pack_params(w_enc, b_enc, w_attn, b_attn, w_cls, b_cls):
    """One-time host-side (numpy) weight packing. Call once when weights change."""
    w_enc = np.asarray(w_enc, np.float32)
    b_enc = np.asarray(b_enc, np.float32)
    w_attn = np.asarray(w_attn, np.float32)
    b_attn = np.asarray(b_attn, np.float32)
    w_cls = np.asarray(w_cls, np.float32)
    b_cls = np.asarray(b_cls, np.float32)

    # encoder block-diagonal + folded score columns + bias row + const column
    w_big = np.zeros((DPAD, SPAD), np.float32)
    for m in range(M):
        w_big[m * D:(m + 1) * D, m * H:(m + 1) * H] = w_enc[m]
        w_big[ONE_ROW, m * H:(m + 1) * H] = b_enc[m, 0]
        # score column: feats_m . w_attn + b_attn, folded through the encoder
        w_big[m * D:(m + 1) * D, SCORE0 + m] = w_enc[m] @ w_attn[0]
        w_big[ONE_ROW, SCORE0 + m] = float(b_enc[m, 0] @ w_attn[0] + b_attn[0, 0])
    w_big[ONE_ROW, CONST_LANE] = 1.0  # slab const-1 lane (drives classifier bias)

    # expansion: softmax weights (lanes 96..98) -> per-modality H-lane blocks,
    # plus the const lane (sum of weights == 1)
    expand = np.zeros((SPAD, SPAD), np.float32)
    for m in range(M):
        expand[SCORE0 + m, m * H:(m + 1) * H] = 1.0
        expand[SCORE0 + m, CONST_LANE] = 1.0

    # modality-stacked, zero-padded classifier weight with bias row
    w_cls_big = np.zeros((SPAD, CPAD), np.float32)
    for m in range(M):
        w_cls_big[m * H:(m + 1) * H, :C] = w_cls
    w_cls_big[CONST_LANE, :C] = b_cls[0]

    return jnp.asarray(w_big), jnp.asarray(expand), jnp.asarray(w_cls_big)


@jax.jit
def multimodal_forward(x, w_big, expand, w_cls_big):
    """x: (M, B, D) raw modality inputs; packed weights from pack_params -> (B, C)."""
    Bsz = x.shape[1]
    # modality axis onto lanes, append constant-1 lane + zero pad to 128 lanes
    x_packed = jnp.transpose(x, (1, 0, 2)).reshape(Bsz, MD)
    x_pad = jnp.concatenate(
        [x_packed.astype(jnp.float32),
         jnp.ones((Bsz, 1), jnp.float32),
         jnp.zeros((Bsz, DPAD - MD - 1), jnp.float32)], axis=1)    # (B, 128)

    vmem = pl.BlockSpec(memory_space=pltpu.MemorySpace.VMEM)
    out_pad = pl.pallas_call(
        multimodal_kernel,
        out_shape=jax.ShapeDtypeStruct((Bsz, CPAD), jnp.float32),
        in_specs=[vmem, vmem, vmem, vmem],
        out_specs=vmem,
    )(x_pad, w_big, expand, w_cls_big)

    # slice the lane-dense output back to the real class count
    return out_pad[:, :C]


def reference(x, w_enc, b_enc, w_attn, b_attn, w_cls, b_cls):
    """Pure-JAX mirror of the PyTorch forward (for verification)."""
    feats = jnp.einsum("mbd,mdh->mbh", x, w_enc) + b_enc                   # (M, B, H)
    scores = jnp.einsum("mbh,h->mb", feats, w_attn[0]) + b_attn[0, 0]      # (M, B)
    w = jax.nn.softmax(scores, axis=0)                                     # over modalities
    fused = jnp.einsum("mbh,mb->bh", feats, w)                             # (B, H)
    return fused @ w_cls + b_cls


if __name__ == "__main__":
    # TODO(synk): ENCODER_REGISTRY encoders are unspecified; synthesized here as
    # deterministic per-modality Linear(D -> H) encoders.
    key = jax.random.PRNGKey(0)
    ks = jax.random.split(key, 7)
    x      = jax.random.normal(ks[0], (M, B, D), jnp.float32)
    w_enc  = jax.random.normal(ks[1], (M, D, H), jnp.float32) * 0.1
    b_enc  = jax.random.normal(ks[2], (M, 1, H), jnp.float32) * 0.1
    w_attn = jax.random.normal(ks[3], (1, H),    jnp.float32) * 0.1
    b_attn = jax.random.normal(ks[4], (1, 1),    jnp.float32) * 0.1
    w_cls  = jax.random.normal(ks[5], (H, C),    jnp.float32) * 0.1
    b_cls  = jax.random.normal(ks[6], (1, C),    jnp.float32) * 0.1

    # one-time packing (hoisted out of the per-call path)
    w_big, expand, w_cls_big = pack_params(w_enc, b_enc, w_attn, b_attn, w_cls, b_cls)

    out = multimodal_forward(x, w_big, expand, w_cls_big)
    jax.block_until_ready(out)

    ref = reference(x, w_enc, b_enc, w_attn, b_attn, w_cls, b_cls)
    assert out.shape == (B, C)
    # tolerance slightly loosened for the EUP approximate reciprocal in the softmax
    assert jnp.allclose(out, ref, atol=1e-3, rtol=1e-3), "mismatch vs reference"
    print("KERNEL_OK")
</pallas_src>

<mosaic_0001>
module attributes {stable_mosaic.version = 11 : i64} {
  func.func @multimodal_kernel(%arg0: memref<16x128xf32, #tpu.memory_space<vmem>>, %arg1: memref<128x128xf32, #tpu.memory_space<vmem>>, %arg2: memref<128x128xf32, #tpu.memory_space<vmem>>, %arg3: memref<128x128xf32, #tpu.memory_space<vmem>>, %arg4: memref<16x128xf32, #tpu.memory_space<vmem>>) attributes {dimension_semantics = [], scalar_prefetch = 0 : i64, scratch_operands = 0 : i64, tpu.core_type = #tpu.core_type<tc>} {
    %c0 = arith.constant 0 : index
    %c0_0 = arith.constant 0 : index
    %0 = vector.load %arg0[%c0, %c0_0] : memref<16x128xf32, #tpu.memory_space<vmem>>, vector<16x128xf32>
    %c0_1 = arith.constant 0 : index
    %c0_2 = arith.constant 0 : index
    %1 = vector.load %arg1[%c0_1, %c0_2] : memref<128x128xf32, #tpu.memory_space<vmem>>, vector<128x128xf32>
    %cst = arith.constant dense<0.000000e+00> : vector<16x128xf32>
    %2 = tpu.matmul %0, %1, %cst {dimension_numbers = #tpu.dot_dimension_numbers<[1], [0], [0], [1], [0, 0, 1, 1], [], []>} : vector<16x128xf32>, vector<128x128xf32>, vector<16x128xf32> -> vector<16x128xf32>
    %3 = tpu.iota {dimensions = array<i32: 1>} : vector<16x128xi32>
    %c96_i32 = arith.constant 96 : i32
    %4 = vector.broadcast %c96_i32 : i32 to vector<16x128xi32>
    %5 = arith.cmpi sge, %3, %4 : vector<16x128xi32>
    %c99_i32 = arith.constant 99 : i32
    %6 = vector.broadcast %c99_i32 : i32 to vector<16x128xi32>
    %7 = arith.cmpi slt, %3, %6 : vector<16x128xi32>
    %8 = arith.andi %5, %7 : vector<16x128xi1>
    %cst_3 = arith.constant 0xFF800000 : f32
    %9 = vector.broadcast %cst_3 : f32 to vector<16x128xf32>
    %10 = arith.select %8, %2, %9 : vector<16x128xi1>, vector<16x128xf32>
    %cst_4 = arith.constant dense<0xFF800000> : vector<16xf32>
    %11 = vector.multi_reduction <maximumf>, %10, %cst_4 [1] : vector<16x128xf32> to vector<16xf32>
    %12 = vector.shape_cast %11 : vector<16xf32> to vector<16x1xf32>
    %13 = vector.broadcast %12 : vector<16x1xf32> to vector<16x128xf32>
    %14 = arith.subf %10, %13 : vector<16x128xf32>
    %15 = math.exp %14 : vector<16x128xf32>
    %cst_5 = arith.constant 0.000000e+00 : f32
    %16 = vector.broadcast %cst_5 : f32 to vector<16x128xf32>
    %17 = arith.select %8, %15, %16 : vector<16x128xi1>, vector<16x128xf32>
    %cst_6 = arith.constant dense<0.000000e+00> : vector<16xf32>
    %18 = vector.multi_reduction <add>, %17, %cst_6 [1] : vector<16x128xf32> to vector<16xf32>
    %19 = vector.shape_cast %18 : vector<16xf32> to vector<16x1xf32>
    %20 = tpu.reciprocal %19 {approx = true} : vector<16x1xf32> -> vector<16x1xf32>
    %21 = vector.broadcast %20 : vector<16x1xf32> to vector<16x128xf32>
    %22 = arith.mulf %17, %21 : vector<16x128xf32>
    %c0_7 = arith.constant 0 : index
    %c0_8 = arith.constant 0 : index
    %23 = vector.load %arg2[%c0_7, %c0_8] : memref<128x128xf32, #tpu.memory_space<vmem>>, vector<128x128xf32>
    %cst_9 = arith.constant dense<0.000000e+00> : vector<16x128xf32>
    %24 = tpu.matmul %22, %23, %cst_9 {dimension_numbers = #tpu.dot_dimension_numbers<[1], [0], [0], [1], [0, 0, 1, 1], [], []>} : vector<16x128xf32>, vector<128x128xf32>, vector<16x128xf32> -> vector<16x128xf32>
    %25 = arith.mulf %2, %24 : vector<16x128xf32>
    %c0_10 = arith.constant 0 : index
    %c0_11 = arith.constant 0 : index
    %26 = vector.load %arg3[%c0_10, %c0_11] : memref<128x128xf32, #tpu.memory_space<vmem>>, vector<128x128xf32>
    %cst_12 = arith.constant dense<0.000000e+00> : vector<16x128xf32>
    %27 = tpu.matmul %25, %26, %cst_12 {dimension_numbers = #tpu.dot_dimension_numbers<[1], [0], [0], [1], [0, 0, 1, 1], [], []>} : vector<16x128xf32>, vector<128x128xf32>, vector<16x128xf32> -> vector<16x128xf32>
    %c0_13 = arith.constant 0 : index
    %c0_14 = arith.constant 0 : index
    %28 = vector.load %arg4[%c0_13, %c0_14] : memref<16x128xf32, #tpu.memory_space<vmem>>, vector<16x128xf32>
    tpu.vector_store %arg4[%c0_13, %c0_14], %27 {strides = array<i32>} : memref<16x128xf32, #tpu.memory_space<vmem>>, vector<16x128xf32>,
    return
  }
}

</mosaic_0001>

<bundles_post_ra>
// kernel: multimodal_forward.1
= control target key start
LH: loop header
LB: loop body
LE: loop exit
PB: predicated region body
PF: predicated region fallthrough
CT: control target
= control target key end

     0   :  { %9 = vsyncpa [#allocation3], 0  ;;  %s400_s0 = inlined_call_operand.vmem [shape: f32[16,128], index: 0, kind: input, shape index: {}]   ;;  %s401_s1 = inlined_call_operand.vmem [shape: f32[128,128], index: 1, kind: input, shape index: {}]   ;;  %s402_s2 = inlined_call_operand.hbm [shape: f32[128,128], index: 2, kind: input, shape index: {}]   ;;  %s403_s3 = inlined_call_operand.hbm [shape: f32[128,128], index: 3, kind: input, shape index: {}]   ;;  %s404_s4 = inlined_call_operand.vmem [shape: f32[16,128], index: 4, kind: output, shape index: {}]  }
   0x1   :  { %s19_s17 = sshll.u32 %s402_s2, 4  ;;  %s20_s17 = int_to_ptr.hbm [resolvable:$true] %s19_s17 }
   0x2   :  { %10 = vsyncpa [#allocation5], 0  ;;  %s285_s18 = smov [#allocation2]   ;;  %s32_s22 = sshll.u32 %s403_s3, 4  ;;  %s33_s22 = int_to_ptr.hbm [resolvable:$true] %s32_s22 }
   0x3   :  { %s21_s19 = sshll.u32 %s285_s18, 4  ;;  %s286_s23 = smov 128   ;;  %s22_s19 = int_to_ptr.vmem [resolvable:$true] %s21_s19 }
   0x4   :  { %s287_s24 = smov 8   ;;  %s288_s25 = smov [#allocation4]  }
   0x5   :  { %27 = dma.hbm_to_vmem [thread:$0]  %s20_s17, 2048, %s22_s19, [#allocation3], %s286_s23, %s286_s23, %s287_s24  }
   0x6   :  { %s34_s26 = sshll.u32 %s288_s25, 4  ;;  %s35_s26 = int_to_ptr.vmem [resolvable:$true] %s34_s26 }
   0x7   :  { %40 = dma.hbm_to_vmem [thread:$0]  %s33_s22, 2048, %s35_s26, [#allocation5], %s286_s23, %s286_s23, %s287_s24  }
   0x8   :  { %281 = dma.done.wait [#allocation3], 2048  }
   0x9   :  { %282 = vsyncadd [#allocation3], 4294965248 }
   0xa   :  { %283 = dma.done.wait [#allocation5], 2048  }
   0xb   :  { %284 = vsyncadd [#allocation5], 4294965248  ;;  %v66_v0 = vld [vmem:[%s401_s1 + $0x78] sm:$0xff]  ;;  %v65_v1 = vld [vmem:[%s401_s1 + $0x70] sm:$0xff]  ;;  %v90_v18 = vlaneseq }
   0xc   :  { %67 = vmatpush.msra.mxu0 %v66_v0  ;;  %205 = vmatpush.msra.mxu3 %v66_v0  ;;  %v64_v2 = vld [vmem:[%s401_s1 + $0x68] sm:$0xff]  ;;  %v63_v3 = vld [vmem:[%s401_s1 + $0x60] sm:$0xff]  ;;  %v62_v4 = vld [vmem:[%s401_s1 + $0x58] sm:$0xff] }
   0xd   :  { %v61_v5 = vld [vmem:[%s401_s1 + $0x50] sm:$0xff]  ;;  %v60_v6 = vld [vmem:[%s401_s1 + $0x48] sm:$0xff]  ;;  %v59_v7 = vld [vmem:[%s401_s1 + $0x40] sm:$0xff]  ;;  %v91_v19 = vand.u32 127, %v90_v18 }
   0xe   :  { %68 = vmatpush.msra.mxu0 %v65_v1  ;;  %206 = vmatpush.msra.mxu3 %v65_v1  ;;  %v58_v8 = vld [vmem:[%s401_s1 + $0x38] sm:$0xff]  ;;  %v57_v9 = vld [vmem:[%s401_s1 + $0x30] sm:$0xff]  ;;  %v56_v10 = vld [vmem:[%s401_s1 + $0x28] sm:$0xff] }
   0xf   :  { %v55_v11 = vld [vmem:[%s401_s1 + $0x20] sm:$0xff]  ;;  %v54_v12 = vld [vmem:[%s401_s1 + $0x18] sm:$0xff]  ;;  %v53_v13 = vld [vmem:[%s401_s1 + $0x10] sm:$0xff]  ;;  %vm92_vm0 = vcmp.ge.s32.totalorder %v91_v19, 96  ;;  %vm93_vm1 = vcmp.lt.s32.totalorder %v91_v19, 99 }
  0x10   :  { %69 = vmatpush.msra.mxu0 %v64_v2  ;;  %207 = vmatpush.msra.mxu3 %v64_v2  ;;  %v52_v14 = vld [vmem:[%s401_s1 + $0x8] sm:$0xff]  ;;  %v51_v15 = vld [vmem:[%s401_s1] sm:$0xff]  ;;  %vm374_vm2 = vmand %vm92_vm0, %vm93_vm1 }
  0x11   :  { %v49_v16 = vld [vmem:[%s400_s0] sm:$0xff]  ;;  %v50_v17 = vld [vmem:[%s400_s0 + $0x8] sm:$0xff]  ;;  %v132_v25 = vld [vmem:[#allocation2 + $0x78] sm:$0xff] }
  0x12   :  { %70 = vmatpush.msra.mxu0 %v63_v3  ;;  %208 = vmatpush.msra.mxu3 %v63_v3  ;;  %v131_v26 = vld [vmem:[#allocation2 + $0x70] sm:$0xff]  ;;  %v130_v27 = vld [vmem:[#allocation2 + $0x68] sm:$0xff]  ;;  %v129_v28 = vld [vmem:[#allocation2 + $0x60] sm:$0xff] }
  0x13   :  { %133 = vmatpush.msra.mxu1 %v132_v25  ;;  %v128_v29 = vld [vmem:[#allocation2 + $0x58] sm:$0xff]  ;;  %v127_v30 = vld [vmem:[#allocation2 + $0x50] sm:$0xff]  ;;  %v126_v31 = vld [vmem:[#allocation2 + $0x48] sm:$0xff] }
  0x14   :  { %71 = vmatpush.msra.mxu0 %v62_v4  ;;  %209 = vmatpush.msra.mxu3 %v62_v4  ;;  %v125_v34 = vld [vmem:[#allocation2 + $0x40] sm:$0xff]  ;;  %v124_v36 = vld [vmem:[#allocation2 + $0x38] sm:$0xff]  ;;  %v123_v37 = vld [vmem:[#allocation2 + $0x30] sm:$0xff] }
  0x15   :  { %134 = vmatpush.msra.mxu1 %v131_v26  ;;  %v122_v38 = vld [vmem:[#allocation2 + $0x28] sm:$0xff]  ;;  %v121_v46 = vld [vmem:[#allocation2 + $0x20] sm:$0xff]  ;;  %v120_v47 = vld [vmem:[#allocation2 + $0x18] sm:$0xff] }
  0x16   :  { %72 = vmatpush.msra.mxu0 %v61_v5  ;;  %210 = vmatpush.msra.mxu3 %v61_v5  ;;  %v119_v48 = vld [vmem:[#allocation2 + $0x10] sm:$0xff]  ;;  %v118_v49 = vld [vmem:[#allocation2 + $0x8] sm:$0xff]  ;;  %v117_v50 = vld [vmem:[#allocation2] sm:$0xff] }
  0x17   :  { %135 = vmatpush.msra.mxu1 %v130_v27  ;;  %v173_v51 = vld [vmem:[#allocation4 + $0x78] sm:$0xff]  ;;  %v172_v52 = vld [vmem:[#allocation4 + $0x70] sm:$0xff]  ;;  %v171_v53 = vld [vmem:[#allocation4 + $0x68] sm:$0xff] }
  0x18   :  { %73 = vmatpush.msra.mxu0 %v60_v6  ;;  %211 = vmatpush.msra.mxu3 %v60_v6  ;;  %v170_v54 = vld [vmem:[#allocation4 + $0x60] sm:$0xff]  ;;  %v169_v55 = vld [vmem:[#allocation4 + $0x58] sm:$0xff]  ;;  %v168_v56 = vld [vmem:[#allocation4 + $0x50] sm:$0xff] }
  0x19   :  { %136 = vmatpush.msra.mxu1 %v129_v28  ;;  %174 = vmatpush.msra.mxu2 %v173_v51  ;;  %v167_v57 = vld [vmem:[#allocation4 + $0x48] sm:$0xff]  ;;  %v166_v58 = vld [vmem:[#allocation4 + $0x40] sm:$0xff]  ;;  %v165_v60 = vld [vmem:[#allocation4 + $0x38] sm:$0xff] }
  0x1a   :  { %74 = vmatpush.msra.mxu0 %v59_v7  ;;  %212 = vmatpush.msra.mxu3 %v59_v7  ;;  %v164_v61 = vld [vmem:[#allocation4 + $0x30] sm:$0xff]  ;;  %v163_v62 = vld [vmem:[#allocation4 + $0x28] sm:$0xff]  ;;  %v162_v63 = vld [vmem:[#allocation4 + $0x20] sm:$0xff] }
  0x1b   :  { %137 = vmatpush.msra.mxu1 %v128_v29  ;;  %175 = vmatpush.msra.mxu2 %v172_v52  ;;  %v161_v3 = vld [vmem:[#allocation4 + $0x18] sm:$0xff]  ;;  %v160_v4 = vld [vmem:[#allocation4 + $0x10] sm:$0xff]  ;;  %v159_v7 = vld [vmem:[#allocation4 + $0x8] sm:$0xff] }
  0x1c   :  { %75 = vmatpush.msra.mxu0 %v58_v8  ;;  %213 = vmatpush.msra.mxu3 %v58_v8  ;;  %v158_v8 = vld [vmem:[#allocation4] sm:$0xff] }
  0x1d   :  { %138 = vmatpush.msra.mxu1 %v127_v30  ;;  %176 = vmatpush.msra.mxu2 %v171_v53 }
  0x1e   :  { %76 = vmatpush.msra.mxu0 %v57_v9  ;;  %214 = vmatpush.msra.mxu3 %v57_v9 }
  0x1f   :  { %139 = vmatpush.msra.mxu1 %v126_v31  ;;  %177 = vmatpush.msra.mxu2 %v170_v54 }
  0x20   :  { %77 = vmatpush.msra.mxu0 %v56_v10  ;;  %215 = vmatpush.msra.mxu3 %v56_v10 }
  0x21   :  { %140 = vmatpush.msra.mxu1 %v125_v34  ;;  %178 = vmatpush.msra.mxu2 %v169_v55 }
  0x22   :  { %78 = vmatpush.msra.mxu0 %v55_v11  ;;  %216 = vmatpush.msra.mxu3 %v55_v11 }
  0x23   :  { %141 = vmatpush.msra.mxu1 %v124_v36  ;;  %179 = vmatpush.msra.mxu2 %v168_v56 }
  0x24   :  { %79 = vmatpush.msra.mxu0 %v54_v12  ;;  %217 = vmatpush.msra.mxu3 %v54_v12 }
  0x25   :  { %142 = vmatpush.msra.mxu1 %v123_v37  ;;  %180 = vmatpush.msra.mxu2 %v167_v57 }
  0x26   :  { %80 = vmatpush.msra.mxu0 %v53_v13  ;;  %218 = vmatpush.msra.mxu3 %v53_v13 }
  0x27   :  { %143 = vmatpush.msra.mxu1 %v122_v38  ;;  %181 = vmatpush.msra.mxu2 %v166_v58 }
  0x28   :  { %81 = vmatpush.msra.mxu0 %v52_v14  ;;  %219 = vmatpush.msra.mxu3 %v52_v14 }
  0x29   :  { %144 = vmatpush.msra.mxu1 %v121_v46  ;;  %182 = vmatpush.msra.mxu2 %v165_v60 }
  0x2a   :  { %82 = vmatpush.msra.mxu0 %v51_v15  ;;  %220 = vmatpush.msra.mxu3 %v51_v15 }
  0x2b   :  { %83 = vmatmul.f32.vlgmr.msra.gmra.mxu0 %v49_v16  ;;  %86 = vmatmul.f32.vlgmr.msra.gmra.mxu3 %v50_v17 }
  0x2c   :  { %145 = vmatpush.msra.mxu1 %v120_v47  ;;  %183 = vmatpush.msra.mxu2 %v164_v61 }
  0x2e   :  { %146 = vmatpush.msra.mxu1 %v119_v48  ;;  %184 = vmatpush.msra.mxu2 %v163_v62 }
  0x30   :  { %147 = vmatpush.msra.mxu1 %v118_v49  ;;  %185 = vmatpush.msra.mxu2 %v162_v63 }
  0x32   :  { %148 = vmatpush.msra.mxu1 %v117_v50  ;;  %186 = vmatpush.msra.mxu2 %v161_v3 }
  0x34   :  { %187 = vmatpush.msra.mxu2 %v160_v4 }
  0x36   :  { %188 = vmatpush.msra.mxu2 %v159_v7 }
  0x38   :  { %189 = vmatpush.msra.mxu2 %v158_v8 }
  0xa8   :  { %v378_v21 = vpop.f32.mrf.mxu0 }
  0xa9   :  { %v95_v22 = vsel %vm374_vm2, %v378_v21, -inf }
  0xaa   :  { %97 = vmax.xlane.f32.xlu0 %v95_v22 }
  0xae   :  { %v383_v23 = vpop.f32.mrf.mxu3 }
  0xaf   :  { %v96_v24 = vsel %vm374_vm2, %v383_v23, -inf }
  0xb2   :  { %99 = vmax.xlane.f32.xlu0 %v96_v24 }
 0x11d   :  { %v98_v32 = vpop.xlane.xlu0 %97 }
 0x11e   :  { %v101_v33 = vsub.f32 %v95_v22, %v98_v32 }
 0x120   :  { %v103_v35 = vmul.f32 1.442695, %v101_v33 }
 0x122   :  { %225 = vpow2.f32 %v103_v35 }
 0x125   :  { %v100_v39 = vpop.xlane.xlu0 %99 }
 0x126   :  { %v102_v40 = vsub.f32 %v96_v24, %v100_v39 }
 0x128   :  { %v226_v41 = vpop.eup %225  ;;  %v105_v42 = vmul.f32 1.442695, %v102_v40 }
 0x129   :  { %v107_v43 = vsel %vm374_vm2, %v226_v41, 0.0 }
 0x12a   :  { %227 = vpow2.f32 %v105_v42  ;;  %109 = vadd.xlane.f32.xlu1 %v107_v43 }
 0x130   :  { %v228_v44 = vpop.eup %227 }
 0x131   :  { %v108_v45 = vsel %vm374_vm2, %v228_v44, 0.0 }
 0x132   :  { %111 = vadd.xlane.f32.xlu1 %v108_v45 }
 0x19d   :  { %v110_v59 = vpop.xlane.xlu1 %109 }
 0x19e   :  { %229 = vrcp.f32 %v110_v59 }
 0x1a4   :  { %v230_v0 = vpop.eup %229 }
 0x1a5   :  { %v112_v1 = vpop.xlane.xlu1 %111  ;;  %v115_v2 = vmul.f32 %v230_v0, %v107_v43 }
 0x1a6   :  { %231 = vrcp.f32 %v112_v1 }
 0x1a7   :  { %149 = vmatmul.f32.vlgmr.msra.gmra.mxu1 %v115_v2 }
 0x1ac   :  { %v232_v5 = vpop.eup %231 }
 0x1ad   :  { %v116_v6 = vmul.f32 %v232_v5, %v108_v45 }
 0x1af   :  { %152 = vmatmul.f32.gmra.mxu1 %v116_v6 }
 0x224   :  { %v150_v9 = vpop.f32.mrf.mxu1 }
 0x225   :  { %v156_v10 = vmul.f32 %v150_v9, %v378_v21 }
 0x227   :  { %190 = vmatmul.f32.vlgmr.msra.gmra.mxu2 %v156_v10 }
 0x22c   :  { %v153_v11 = vpop.f32.mrf.mxu1 }
 0x22d   :  { %v157_v12 = vmul.f32 %v153_v11, %v383_v23 }
 0x22f   :  { %193 = vmatmul.f32.gmra.mxu2 %v157_v12 }
 0x2aa   :  { %v191_v13 = vpop.f32.mrf.mxu2 }
 0x2ab   :  { %197 = vst [vmem:[%s404_s4] sm:$0xff] %v191_v13 }
 0x2b2   :  { %v194_v14 = vpop.f32.mrf.mxu2 }
 0x2b3   :  { %198 = vst [vmem:[%s404_s4 + $0x8] sm:$0xff] %v194_v14 }
 0x2b4   :  { %203 = vsyncpa [#allocation3], 1 }
 0x2b5   :  { %204 = vsyncpa [#allocation5], 1 }

</bundles_post_ra>
